<compile_context>
chip_gen: v7x
topology: tpu7x:2x2x1
jax: 0.10.0
libtpu: 0.0.40
codegen_flags: <defaults>
</compile_context>

<pallas_src>
import functools

import jax
import jax.numpy as jnp
from jax import lax
from jax.experimental import pallas as pl
from jax.experimental.pallas import tpu as pltpu

# ---- hyperparameters (the `param` dict of the PyTorch module) ----
MAT_SIZE   = (16, 16)   # param['matrix_size'] -> (H, W)
NUM_LAYERS = 2          # param['num_layers']
POOL       = 2          # param['maxpool_kernel_size']
CKN        = 4          # param['conv_kernel_num']
DENSED     = 32         # param['densed_size']
N_CLASS    = 2          # global n_class in the original file
BATCH      = 2

H, W = MAT_SIZE
DIVIDEN = POOL ** NUM_LAYERS
K0 = max(1, int(H / DIVIDEN))   # conv0_recur kernel extent (along width)
K1 = max(1, int(W / DIVIDEN))   # conv1_recur kernel extent (along height)

# The fused-branch layout requires both branches to have identical spatial
# structure (true for these hyperparameters).
assert H == W, "branch fusion assumes square matrix_size"
assert K0 == K1, "branch fusion assumes equal recur kernel extents"
K = K0

LANES = 128             # lane width of the parameter slab / padded output


def feat_len(start, k):
    """Surviving spatial length of one branch after the conv/pool stack
    (floor pooling, matching MaxPool2d with ceil_mode=False)."""
    v = start // POOL                       # conv0/conv1 keep this axis; pool
    for _ in range(NUM_LAYERS - 1):
        v = (v - k + 1) // POOL             # 'valid' conv_recur then pool
    return v


W0F = feat_len(W, K0)                       # branch-0 final width
H1F = feat_len(H, K1)                       # branch-1 final height
FEAT = CKN * (W0F + H1F)                    # LazyLinear in_features
assert W0F >= 1 and H1F >= 1, "hyperparameters shrink a branch to zero length"


def _round_up(v, m):
    return (v + m - 1) // m * m


class _Layout:
    """Row offsets of each parameter block inside the packed (rows, 128) slab.
    All offsets are multiples of 8 sublanes for clean, unmasked-ish loads."""

    def __init__(self, n):
        R = 2 * n * CKN                      # fused rows: sample x branch x chan
        self.n = n
        self.R = R
        self.w1st_cols = n * (H + W) + 1     # +1: bias column (ones-row trick)
        self.wrk_cols = K * R + 1            # K taps concatenated, +1 bias col
        self.off_w1st = 0
        self.off_wrk = R
        self.off_wd = 2 * R
        self.off_bd = 2 * R + FEAT
        self.off_wdec = _round_up(self.off_bd + 1, 8)
        self.off_bdec = self.off_wdec + DENSED
        self.rows = _round_up(self.off_bdec + 1, 8)


# ------------------------------ kernel ---------------------------------------

def _make_kernel(lay):
    n, R = lay.n, lay.R

    def pool_last(t):
        # MaxPool window=stride=POOL along lanes (floor remainder): reshape +
        # max(axis=-1).  Matches nn.MaxPool2d((1,P)) / ((P,1)) applied to
        # (N,C,1,L) / (N,C,L,1) — only the surviving spatial axis is pooled.
        r, l = t.shape
        assert l >= POOL, "pooled axis shrank below the pool window"
        lp = (l // POOL) * POOL
        return jnp.max(t[:, :lp].reshape(r, lp // POOL, POOL), axis=-1)

    def kernel(x_ref, p_ref, out_ref):
        # Data slab: per sample [x[n] (H rows) ; x[n]^T (W rows)], then one
        # ones row so the first-stage conv bias folds into the matmul.
        x = x_ref[...]                                        # (n*(H+W)+1, W)

        # --- stage 1: conv0 AND conv1 of every sample as ONE MXU matmul
        # (batch+branch block-diagonal weight, bias folded), shared relu+pool.
        w1st = p_ref[lay.off_w1st:lay.off_w1st + R, 0:lay.w1st_cols]
        t = jnp.dot(w1st, x, preferred_element_type=jnp.float32)   # (R, W)
        t = pool_last(jnp.maximum(t, 0.0))

        # --- recur stages: the K taps of conv*_recur are fused into ONE
        # matmul by stacking the K shifted views (plus a ones row for the
        # bias) on sublanes against a pre-concatenated weight.  This removes
        # K-1 MXU push/vpop round trips per stage (MRF on v5e/v6e); on v7x
        # the MRB could also accumulate a per-tap form in place, but the fused
        # form is equally fine there.
        wrk = p_ref[lay.off_wrk:lay.off_wrk + R, 0:lay.wrk_cols]
        for _ in range(NUM_LAYERS - 1):
            lout = t.shape[1] - K + 1
            assert lout >= 1, "recur conv kernel larger than its input"
            rhs = jnp.concatenate(
                [t[:, k:k + lout] for k in range(K)]
                + [jnp.ones((1, lout), jnp.float32)], axis=0)   # (K*R+1, lout)
            t = jnp.dot(wrk, rhs, preferred_element_type=jnp.float32)
            t = pool_last(jnp.maximum(t, 0.0))

        # --- flatten: rows are sample-major / branch-mid / channel-minor and
        # lanes are the surviving spatial axis, so a plain reshape reproduces
        # torch.flatten(temp*, 1) + torch.cat(..., dim=1) exactly.
        feat = t.reshape(n, 2 * CKN * t.shape[1])               # (n, FEAT)

        # --- dense + relu
        wd = p_ref[lay.off_wd:lay.off_wd + FEAT, 0:DENSED]      # (FEAT, D)
        bd = p_ref[lay.off_bd:lay.off_bd + 1, 0:DENSED]         # (1, D)
        h = jnp.maximum(
            jnp.dot(feat, wd, preferred_element_type=jnp.float32) + bd, 0.0)

        # --- decision + softmax(dim=1).  Decision weight is stored padded to
        # 128 lanes so the final store is lane-dense; the softmax masks the
        # padding lanes.  Exact divide for parity with F.softmax.
        wdec = p_ref[lay.off_wdec:lay.off_wdec + DENSED, :]     # (D, 128)
        bdec = p_ref[lay.off_bdec:lay.off_bdec + 1, :]          # (1, 128)
        logits = jnp.dot(h, wdec, preferred_element_type=jnp.float32) + bdec
        col = lax.broadcasted_iota(jnp.int32, logits.shape, 1)
        valid = col < N_CLASS
        m = jnp.max(jnp.where(valid, logits, -jnp.inf), axis=1, keepdims=True)
        e = jnp.where(valid, jnp.exp(logits - m), 0.0)
        out_ref[...] = e / jnp.sum(e, axis=1, keepdims=True)

    return kernel


# ----------------------- wrapper-side packing (one-time) ----------------------

def _block_diag_batch(m, n):
    """(A, B) -> (n*A, n*B): n copies of m on the diagonal (batch packing)."""
    a, b = m.shape
    eye = jnp.eye(n, dtype=m.dtype)
    return (eye[:, None, :, None] * m[None, :, None, :]).reshape(n * a, n * b)


def _block_diag2(m0, m1):
    """Block-diagonal of two matrices (branch packing)."""
    a0, b0 = m0.shape
    a1, b1 = m1.shape
    top = jnp.concatenate([m0, jnp.zeros((a0, b1), m0.dtype)], axis=1)
    bot = jnp.concatenate([jnp.zeros((a1, b0), m1.dtype), m1], axis=1)
    return jnp.concatenate([top, bot], axis=0)


def pack_params(params, n):
    """Pack all 12 parameters into ONE (rows, 128) f32 slab (single DMA).

    Called once per (params, batch size) and reused across forward calls, so
    none of this packing work sits on the per-step forward path.
    """
    lay = _Layout(n)
    # TODO(synk): the block-diagonal packing is O(n^2); for large batches
    # switch to a per-sample-block grid with shared small weights instead.
    assert lay.w1st_cols <= LANES and lay.wrk_cols <= LANES, \
        "batch too large for the fused single-slab layout"

    # stage-1 weight: per-sample block = blockdiag(conv0 (C,H), conv1 (C,W)),
    # batch block-diagonal, bias appended as the last column.
    blk = _block_diag2(params['w0'], params['w1'])              # (2C, H+W)
    b1 = jnp.tile(jnp.concatenate([params['b0'], params['b1']], axis=0), (n, 1))
    w1st = jnp.concatenate([_block_diag_batch(blk, n), b1], axis=1)

    # recur weight: per-tap blockdiag(conv0_recur[k], conv1_recur[k]), batch
    # block-diagonal, K taps concatenated along columns, bias last column.
    taps = [_block_diag_batch(
        _block_diag2(params['w0r'][k], params['w1r'][k]), n) for k in range(K)]
    br = jnp.tile(jnp.concatenate([params['b0r'], params['b1r']], axis=0), (n, 1))
    wrk = jnp.concatenate(taps + [br], axis=1)

    wdec_pad = jnp.zeros((DENSED, LANES), jnp.float32)
    wdec_pad = wdec_pad.at[:, :N_CLASS].set(params['wdec'])
    bdec_pad = jnp.zeros((1, LANES), jnp.float32)
    bdec_pad = bdec_pad.at[:, :N_CLASS].set(params['bdec'])

    slab = jnp.zeros((lay.rows, LANES), jnp.float32)
    slab = slab.at[lay.off_w1st:lay.off_w1st + lay.R, :lay.w1st_cols].set(w1st)
    slab = slab.at[lay.off_wrk:lay.off_wrk + lay.R, :lay.wrk_cols].set(wrk)
    slab = slab.at[lay.off_wd:lay.off_wd + FEAT, :DENSED].set(params['wd'])
    slab = slab.at[lay.off_bd:lay.off_bd + 1, :DENSED].set(params['bd'])
    slab = slab.at[lay.off_wdec:lay.off_wdec + DENSED, :].set(wdec_pad)
    slab = slab.at[lay.off_bdec:lay.off_bdec + 1, :].set(bdec_pad)
    return slab


def init_params(key):
    ks = jax.random.split(key, 12)

    def rnd(k, shape, scale=0.1):
        return scale * jax.random.normal(k, shape, jnp.float32)

    # Parameters stored pre-reshaped (no torch checkpoint to load):
    #   conv0 (C,1,H,1)->(C,H);  conv0_recur (C,C,1,K0)->(K0,C,C)
    #   conv1 (C,1,1,W)->(C,W);  conv1_recur (C,C,K1,1)->(K1,C,C)
    #   dense (D,FEAT)->(FEAT,D);  decision (NC,D)->(D,NC)
    return dict(
        w0=rnd(ks[0], (CKN, H)),             b0=rnd(ks[1], (CKN, 1)),
        w0r=rnd(ks[2], (K0, CKN, CKN)),      b0r=rnd(ks[3], (CKN, 1)),
        w1=rnd(ks[4], (CKN, W)),             b1=rnd(ks[5], (CKN, 1)),
        w1r=rnd(ks[6], (K1, CKN, CKN)),      b1r=rnd(ks[7], (CKN, 1)),
        wd=rnd(ks[8], (FEAT, DENSED)),       bd=rnd(ks[9], (1, DENSED)),
        wdec=rnd(ks[10], (DENSED, N_CLASS)), bdec=rnd(ks[11], (1, N_CLASS)),
    )


# ------------------------------ forward ---------------------------------------

@functools.lru_cache(maxsize=None)
def _make_forward(n):
    lay = _Layout(n)
    kernel = _make_kernel(lay)

    # Gridless single program: total VMEM footprint is <64 KiB, so the fused
    # form wins at small batch.
    # TODO(synk): for large batches add grid=(num_sample_blocks,) with
    # dimension_semantics=("parallel",) (v7x dual TensorCore), drop the O(n^2)
    # block-diagonal weights in favour of BlockSpec-indexed shared weights,
    # and pack samples along lanes for vreg utilization.
    call = pl.pallas_call(
        kernel,
        out_shape=jax.ShapeDtypeStruct((n, LANES), jnp.float32),
        in_specs=[pl.BlockSpec(memory_space=pltpu.MemorySpace.VMEM),
                  pl.BlockSpec(memory_space=pltpu.MemorySpace.VMEM)],
        out_specs=pl.BlockSpec(memory_space=pltpu.MemorySpace.VMEM),
    )

    @jax.jit
    def fwd(x, p_slab):
        # x: (N, 1, H*W) -- mirrors self.reshape(input) -> (N, 1, H, W)
        xs = x.reshape(n, H, W).astype(jnp.float32)
        xt = jnp.transpose(xs, (0, 2, 1))     # wrapper-side transpose: no
        #                                       XLU work inside the kernel
        body = jnp.concatenate([xs, xt], axis=1).reshape(n * (H + W), W)
        x_slab = jnp.concatenate([body, jnp.ones((1, W), jnp.float32)], axis=0)
        out = call(x_slab, p_slab)
        return out[:, :N_CLASS]

    return fwd


def unlimited_forward(x, p_slab):
    return _make_forward(x.shape[0])(x, p_slab)


if __name__ == "__main__":
    key = jax.random.PRNGKey(0)
    kx, kp = jax.random.split(key)
    x = jax.random.normal(kx, (BATCH, 1, H * W), jnp.float32)
    params = init_params(kp)
    p_slab = pack_params(params, BATCH)       # hoisted: packed once, reused
    out = jax.block_until_ready(unlimited_forward(x, p_slab))
    assert out.shape == (BATCH, N_CLASS)
    assert bool(jnp.all(jnp.isfinite(out)))
    assert bool(jnp.all(jnp.abs(jnp.sum(out, axis=1) - 1.0) < 1e-5))
    print("KERNEL_OK")
</pallas_src>

<mosaic_0001>
module attributes {stable_mosaic.version = 11 : i64} {
  func.func @kernel(%arg0: memref<65x16xf32, #tpu.memory_space<vmem>>, %arg1: memref<96x128xf32, #tpu.memory_space<vmem>>, %arg2: memref<2x128xf32, #tpu.memory_space<vmem>>) attributes {dimension_semantics = [], scalar_prefetch = 0 : i64, scratch_operands = 0 : i64, tpu.core_type = #tpu.core_type<tc>} {
    %c0 = arith.constant 0 : index
    %c0_0 = arith.constant 0 : index
    %0 = vector.load %arg0[%c0, %c0_0] : memref<65x16xf32, #tpu.memory_space<vmem>>, vector<65x16xf32>
    %c0_1 = arith.constant 0 : index
    %c0_2 = arith.constant 0 : index
    %1 = vector.load %arg1[%c0_1, %c0_2] : memref<96x128xf32, #tpu.memory_space<vmem>>, vector<16x65xf32>
    %cst = arith.constant dense<0.000000e+00> : vector<16x16xf32>
    %2 = tpu.matmul %1, %0, %cst {dimension_numbers = #tpu.dot_dimension_numbers<[1], [0], [0], [1], [0, 0, 1, 1], [], []>} : vector<16x65xf32>, vector<65x16xf32>, vector<16x16xf32> -> vector<16x16xf32>
    %cst_3 = arith.constant 0.000000e+00 : f32
    %3 = vector.broadcast %cst_3 : f32 to vector<16x16xf32>
    %4 = arith.maximumf %2, %3 : vector<16x16xf32>
    %5 = vector.shape_cast %4 : vector<16x16xf32> to vector<16x8x2xf32>
    %cst_4 = arith.constant dense<0xFF800000> : vector<16x8xf32>
    %6 = vector.multi_reduction <maximumf>, %5, %cst_4 [2] : vector<16x8x2xf32> to vector<16x8xf32>
    %c16 = arith.constant 16 : index
    %c0_5 = arith.constant 0 : index
    %7 = vector.load %arg1[%c16, %c0_5] : memref<96x128xf32, #tpu.memory_space<vmem>>, vector<16x65xf32>
    %8 = vector.extract_strided_slice %6 {offsets = [0, 0], sizes = [16, 5], strides = [1, 1]} : vector<16x8xf32> to vector<16x5xf32>
    %9 = vector.extract_strided_slice %6 {offsets = [0, 1], sizes = [16, 5], strides = [1, 1]} : vector<16x8xf32> to vector<16x5xf32>
    %10 = vector.extract_strided_slice %6 {offsets = [0, 2], sizes = [16, 5], strides = [1, 1]} : vector<16x8xf32> to vector<16x5xf32>
    %11 = vector.extract_strided_slice %6 {offsets = [0, 3], sizes = [16, 5], strides = [1, 1]} : vector<16x8xf32> to vector<16x5xf32>
    %cst_6 = arith.constant 1.000000e+00 : f32
    %12 = vector.broadcast %cst_6 : f32 to vector<1x5xf32>
    %13 = tpu.concatenate %8, %9, %10, %11, %12 in 0 : vector<16x5xf32>, vector<16x5xf32>, vector<16x5xf32>, vector<16x5xf32>, vector<1x5xf32> -> vector<65x5xf32>
    %cst_7 = arith.constant dense<0.000000e+00> : vector<16x5xf32>
    %14 = tpu.matmul %7, %13, %cst_7 {dimension_numbers = #tpu.dot_dimension_numbers<[1], [0], [0], [1], [0, 0, 1, 1], [], []>} : vector<16x65xf32>, vector<65x5xf32>, vector<16x5xf32> -> vector<16x5xf32>
    %cst_8 = arith.constant 0.000000e+00 : f32
    %15 = vector.broadcast %cst_8 : f32 to vector<16x5xf32>
    %16 = arith.maximumf %14, %15 : vector<16x5xf32>
    %17 = vector.extract_strided_slice %16 {offsets = [0, 0], sizes = [16, 4], strides = [1, 1]} : vector<16x5xf32> to vector<16x4xf32>
    %18 = vector.shape_cast %17 : vector<16x4xf32> to vector<16x2x2xf32>
    %cst_9 = arith.constant dense<0xFF800000> : vector<16x2xf32>
    %19 = vector.multi_reduction <maximumf>, %18, %cst_9 [2] : vector<16x2x2xf32> to vector<16x2xf32>
    %20 = vector.shape_cast %19 : vector<16x2xf32> to vector<2x16xf32>
    %c32 = arith.constant 32 : index
    %c0_10 = arith.constant 0 : index
    %21 = vector.load %arg1[%c32, %c0_10] : memref<96x128xf32, #tpu.memory_space<vmem>>, vector<16x32xf32>
    %c48 = arith.constant 48 : index
    %c0_11 = arith.constant 0 : index
    %22 = vector.load %arg1[%c48, %c0_11] : memref<96x128xf32, #tpu.memory_space<vmem>>, vector<1x32xf32>
    %cst_12 = arith.constant dense<0.000000e+00> : vector<2x32xf32>
    %23 = tpu.matmul %20, %21, %cst_12 {dimension_numbers = #tpu.dot_dimension_numbers<[1], [0], [0], [1], [0, 0, 1, 1], [], []>} : vector<2x16xf32>, vector<16x32xf32>, vector<2x32xf32> -> vector<2x32xf32>
    %24 = vector.broadcast %22 : vector<1x32xf32> to vector<2x32xf32>
    %25 = arith.addf %23, %24 : vector<2x32xf32>
    %cst_13 = arith.constant 0.000000e+00 : f32
    %26 = vector.broadcast %cst_13 : f32 to vector<2x32xf32>
    %27 = arith.maximumf %25, %26 : vector<2x32xf32>
    %c56 = arith.constant 56 : index
    %c0_14 = arith.constant 0 : index
    %28 = vector.load %arg1[%c56, %c0_14] : memref<96x128xf32, #tpu.memory_space<vmem>>, vector<32x128xf32>
    %c88 = arith.constant 88 : index
    %c0_15 = arith.constant 0 : index
    %29 = vector.load %arg1[%c88, %c0_15] : memref<96x128xf32, #tpu.memory_space<vmem>>, vector<1x128xf32>
    %cst_16 = arith.constant dense<0.000000e+00> : vector<2x128xf32>
    %30 = tpu.matmul %27, %28, %cst_16 {dimension_numbers = #tpu.dot_dimension_numbers<[1], [0], [0], [1], [0, 0, 1, 1], [], []>} : vector<2x32xf32>, vector<32x128xf32>, vector<2x128xf32> -> vector<2x128xf32>
    %31 = vector.broadcast %29 : vector<1x128xf32> to vector<2x128xf32>
    %32 = arith.addf %30, %31 : vector<2x128xf32>
    %33 = tpu.iota {dimensions = array<i32: 1>} : vector<2x128xi32>
    %c2_i32 = arith.constant 2 : i32
    %34 = vector.broadcast %c2_i32 : i32 to vector<2x128xi32>
    %35 = arith.cmpi slt, %33, %34 : vector<2x128xi32>
    %cst_17 = arith.constant 0xFF800000 : f32
    %36 = vector.broadcast %cst_17 : f32 to vector<2x128xf32>
    %37 = arith.select %35, %32, %36 : vector<2x128xi1>, vector<2x128xf32>
    %cst_18 = arith.constant dense<0xFF800000> : vector<2xf32>
    %38 = vector.multi_reduction <maximumf>, %37, %cst_18 [1] : vector<2x128xf32> to vector<2xf32>
    %39 = vector.shape_cast %38 : vector<2xf32> to vector<2x1xf32>
    %40 = vector.broadcast %39 : vector<2x1xf32> to vector<2x128xf32>
    %41 = arith.subf %32, %40 : vector<2x128xf32>
    %42 = math.exp %41 : vector<2x128xf32>
    %cst_19 = arith.constant 0.000000e+00 : f32
    %43 = vector.broadcast %cst_19 : f32 to vector<2x128xf32>
    %44 = arith.select %35, %42, %43 : vector<2x128xi1>, vector<2x128xf32>
    %cst_20 = arith.constant dense<0.000000e+00> : vector<2xf32>
    %45 = vector.multi_reduction <add>, %44, %cst_20 [1] : vector<2x128xf32> to vector<2xf32>
    %46 = vector.shape_cast %45 : vector<2xf32> to vector<2x1xf32>
    %47 = vector.broadcast %46 : vector<2x1xf32> to vector<2x128xf32>
    %48 = arith.divf %44, %47 : vector<2x128xf32>
    %c0_21 = arith.constant 0 : index
    %c0_22 = arith.constant 0 : index
    %49 = vector.load %arg2[%c0_21, %c0_22] : memref<2x128xf32, #tpu.memory_space<vmem>>, vector<2x128xf32>
    tpu.vector_store %arg2[%c0_21, %c0_22], %48 {strides = array<i32>} : memref<2x128xf32, #tpu.memory_space<vmem>>, vector<2x128xf32>,
    return
  }
}

</mosaic_0001>

<bundles_post_ra>
// kernel: fwd.1
= control target key start
LH: loop header
LB: loop body
LE: loop exit
PB: predicated region body
PF: predicated region fallthrough
CT: control target
= control target key end

     0   :  { %vm23_vm0 = vcmask 531456   ;;  %s2126_s0 = inlined_call_operand.vmem [shape: f32[65,16], index: 0, kind: input, shape index: {}]   ;;  %s2127_s1 = inlined_call_operand.vmem [shape: f32[96,128], index: 1, kind: input, shape index: {}]   ;;  %s2128_s2 = inlined_call_operand.hbm [shape: f32[2,128], index: 2, kind: output, shape index: {}]  }
   0x1   :  { %v12_v0 = vld [vmem:[%s2126_s0] sm:$0xff]  ;;  %v13_v1 = vld [vmem:[%s2126_s0 + $0x8] sm:$0xff]  ;;  %v14_v2 = vld [vmem:[%s2126_s0 + $0x10] sm:$0xff] }
   0x2   :  { %v1512_v3 = vpack.c.bf16 %v13_v1, %v12_v0  ;;  %v15_v4 = vld [vmem:[%s2126_s0 + $0x18] sm:$0xff]  ;;  %v16_v6 = vld [vmem:[%s2126_s0 + $0x20] sm:$0xff]  ;;  %v17_v7 = vld [vmem:[%s2126_s0 + $0x28] sm:$0xff] }
   0x3   :  { %v1516_v5 = vpack.c.bf16 %v15_v4, %v14_v2  ;;  %v21_v8 = vld [vmem:[%s2127_s1] sm:$0xff] }
   0x4   :  { %1513 = vmatprep.subr.bf16.mxu0 %v1512_v3 }
   0x5   :  { %7 = vsyncpa [#allocation3], 0  ;;  %1515 = vmatpush3.bf16.msra.mxu0 %v1512_v3  ;;  %1470 = vmatprep.mubr.msk.f32.mxu0 %vm23_vm0, %v21_v8  ;;  %v1520_v9 = vpack.c.bf16 %v17_v7, %v16_v6  ;;  %v18_v10 = vld [vmem:[%s2126_s0 + $0x30] sm:$0xff]  ;;  %v19_v11 = vld [vmem:[%s2126_s0 + $0x38] sm:$0xff]  ;;  %vm30_vm1 = vcmask 1040384   ;;  %s1598_s3 = smov 124   ;;  %v160_v29 = vlaneseq }
   0x6   :  { %1517 = vmatprep.subr.bf16.mxu0 %v1516_v5  ;;  %v1524_v12 = vpack.c.bf16 %v19_v11, %v18_v10  ;;  %v20_v13 = vld [vmem:[%s2126_s0 + $0x40] sm:$0x1]  ;;  %v22_v14 = vld [vmem:[%s2127_s1 + $0x8] sm:$0xff]  ;;  %s1599_s0 = smov 126   ;;  %s1600_s4 = smov 122   ;;  %vm427_vm2 = vcmask 15360  }
   0x7   :  { %s1601_s5 = smov 120   ;;  %s1602_s6 = smov 118   ;;  %v1605_v27 = vmov 1983009808   ;;  %v1702_v33 = vshrl.u32 %v160_v29, 7  ;;  %vm560_vm3 = vcmask 1041409  }
   0x8   :  { %s1603_s7 = smov 116   ;;  %s1604_s8 = smov 114   ;;  %v158_v28 = vunpack.c.l.s4 %v1605_v27  ;;  %v1606_v34 = vmov 1934713408   ;;  %vm562_vm4 = vcmask 1042434   ;;  %vm564_vm5 = vcmask 1043459  }
   0x9   :  { %1519 = vmatpush3.bf16.msra.mxu0 %v1516_v5  ;;  %v222_v35 = vunpack.c.l.s4 %v1606_v34  ;;  %vm566_vm6 = vcmask 1044484   ;;  %vm568_vm7 = vcmask 1045509   ;;  %vm570_vm8 = vcmask 1046534  }
   0xa   :  { %1521 = vmatprep.subr.bf16.mxu0 %v1520_v9  ;;  %v159_v32 = vunpack.c.0.s8 %v158_v28  ;;  %vm572_vm9 = vcmask 1047559   ;;  %vm1052_vm10 = vcmask 9216   ;;  %vm1611_vm11 = vmmov 0  }
   0xb   :  { %v223_v43 = vunpack.c.0.s8 %v222_v35  ;;  %vm1213_vm12 = vcmask 130112   ;;  %vm1225_vm13 = vcmask 130048   ;;  %vm1308_vm14 = vcmask 261120  }
   0xc   :  { %v1708_v40 = vsub.s32 %v159_v32, %v1702_v33 }
   0xd   :  { %1523 = vmatpush3.bf16.msra.mxu0 %v1520_v9  ;;  %v1722_v54 = vsub.s32 %v223_v43, %v1702_v33 }
   0xe   :  { %1525 = vmatprep.subr.bf16.mxu0 %v1524_v12 }
  0x11   :  { %1527 = vmatpush3.bf16.msra.mxu0 %v1524_v12 }
  0x12   :  { %1468 = vmatprep.subr.msk.mxu0 %vm30_vm1, %v20_v13 }
  0x15   :  { %1469 = vmatpush3.msk.msra.mxu0 %vm30_vm1, %v20_v13 }
  0x16   :  { %1471 = vmatmul.mubr.msk.f32.vlgmr.msra.gmra.mrb[0].mxu0 %vm23_vm0, %v22_v14 }
  0xe9   :  { %v1472_v15 = vpop.f32.mrb[0].mxu0 }
  0xea   :  { %v1665_v16 = vmax.f32 %v1472_v15, 0.0  ;;  %v100_v17 = vpop.f32.mrb[1].mxu0 }
  0xeb   :  { %v1670_v18 = vmax.f32 %v100_v17, 0.0 }
  0xec   :  { %121 = vrot.lane.b32.xlu1 %v1665_v16, %s1598_s3  ;;  %115 = vrot.lane.b32.xlu0 %v1665_v16, %s1599_s0 }
  0xf0   :  { %127 = vrot.lane.b32.xlu1 %v1665_v16, %s1600_s4  ;;  %113 = vrot.lane.b32.xlu0 %v1670_v18, %s1599_s0 }
  0xf4   :  { %133 = vrot.lane.b32.xlu1 %v1665_v16, %s1601_s5  ;;  %125 = vrot.lane.b32.xlu0 %v1670_v18, %s1600_s4 }
  0xf8   :  { %139 = vrot.lane.b32.xlu1 %v1665_v16, %s1602_s6  ;;  %131 = vrot.lane.b32.xlu0 %v1670_v18, %s1601_s5 }
  0xfc   :  { %145 = vrot.lane.b32.xlu1 %v1665_v16, %s1603_s7  ;;  %137 = vrot.lane.b32.xlu0 %v1670_v18, %s1602_s6 }
 0x100   :  { %119 = vrot.lane.b32.xlu1 %v1670_v18, %s1598_s3  ;;  %143 = vrot.lane.b32.xlu0 %v1670_v18, %s1603_s7 }
 0x104   :  { %151 = vrot.lane.b32.xlu1 %v1665_v16, %s1604_s8  ;;  %149 = vrot.lane.b32.xlu0 %v1670_v18, %s1604_s8 }
 0x15e   :  { %v1685_v19 = vpop.permute.xlu1 %121  ;;  %v1687_v20 = vpop.permute.xlu0 %115 }
 0x15f   :  { %v291_v41 = vcombine.low %v1665_v16, %v1685_v19  ;;  %v292_v62 = vcombine.high %v1665_v16, %v1685_v19 }
 0x161   :  { %v299_v50 = vrot.slane %v291_v41, %v1708_v40 }
 0x162   :  { %v1689_v21 = vpop.permute.xlu1 %127  ;;  %v1691_v22 = vpop.permute.xlu0 %113 }
 0x163   :  { %v307_v36 = vcombine.low %v1687_v20, %v1689_v21  ;;  %v308_v14 = vcombine.high %v1687_v20, %v1689_v21 }
 0x165   :  { %v315_v44 = vrot.slane %v307_v36, %v1708_v40  ;;  %v306_v36 = vrot.slane %v292_v62, %v1708_v40 }
 0x166   :  { %v1693_v23 = vpop.permute.xlu1 %133  ;;  %v1695_v24 = vpop.permute.xlu0 %125 }
 0x167   :  { %v171_v42 = vcombine.low %v1691_v22, %v1695_v24  ;;  %v355_v55 = vcombine.low %v299_v50, %v315_v44  ;;  %v172_v63 = vcombine.high %v1691_v22, %v1695_v24  ;;  %v356_v15 = vcombine.high %v299_v50, %v315_v44 }
 0x169   :  { %v179_v53 = vrot.slane %v171_v42, %v1708_v40  ;;  %v363_v8 = vrot.slane %v355_v55, %v1722_v54  ;;  %v186_v21 = vrot.slane %v172_v63, %v1708_v40  ;;  %v370_v34 = vrot.slane %v356_v15, %v1722_v54 }
 0x16a   :  { %v1697_v25 = vpop.permute.xlu1 %139  ;;  %v132_v26 = vpop.permute.xlu0 %131 }
 0x16e   :  { %v1699_v30 = vpop.permute.xlu1 %145  ;;  %v138_v31 = vpop.permute.xlu0 %137 }
 0x16f   :  { %v323_v45 = vcombine.low %v1693_v23, %v1699_v30  ;;  %v324_v16 = vcombine.high %v1693_v23, %v1699_v30 }
 0x171   :  { %v331_v56 = vrot.slane %v323_v45, %v1708_v40  ;;  %v338_v32 = vrot.slane %v324_v16, %v1708_v40  ;;  %v1791_v16 = vand.u32 127, %v160_v29 }
 0x172   :  { %v120_v37 = vpop.permute.xlu1 %119  ;;  %v144_v38 = vpop.permute.xlu0 %143 }
 0x173   :  { %v155_v39 = vcombine.low %v1670_v18, %v120_v37  ;;  %v187_v49 = vcombine.low %v132_v26, %v144_v38  ;;  %v156_v0 = vcombine.high %v1670_v18, %v120_v37  ;;  %v188_v3 = vcombine.high %v132_v26, %v144_v38 }
 0x174   :  { %vm1382_vm15 = vcmp.lt.s32.totalorder %v1791_v16, 2 }
 0x175   :  { %v163_v48 = vrot.slane %v155_v39, %v1708_v40  ;;  %v195_v60 = vrot.slane %v187_v49, %v1708_v40  ;;  %v170_v18 = vrot.slane %v156_v0, %v1708_v40  ;;  %v202_v19 = vrot.slane %v188_v3, %v1708_v40 }
 0x176   :  { %v152_v46 = vpop.permute.xlu1 %151  ;;  %v150_v47 = vpop.permute.xlu0 %149 }
 0x177   :  { %v339_v51 = vcombine.low %v1697_v25, %v152_v46  ;;  %v203_v52 = vcombine.low %v138_v31, %v150_v47  ;;  %v219_v59 = vcombine.low %v163_v48, %v179_v53  ;;  %v204_v61 = vcombine.high %v138_v31, %v150_v47 }
 0x178   :  { %v220_v2 = vcombine.high %v163_v48, %v179_v53  ;;  %v340_v6 = vcombine.high %v1697_v25, %v152_v46  ;;  %v322_v31 = vrot.slane %v308_v14, %v1708_v40  ;;  %v235_v35 = vcombine.low %v170_v18, %v186_v21 }
 0x179   :  { %v347_v57 = vrot.slane %v339_v51, %v1708_v40  ;;  %v211_v58 = vrot.slane %v203_v52, %v1708_v40  ;;  %v218_v10 = vrot.slane %v204_v61, %v1708_v40  ;;  %v1738_v11 = vrot.slane %v219_v59, %v1722_v54 }
 0x17a   :  { %v234_v24 = vrot.slane %v220_v2, %v1722_v54  ;;  %v354_v25 = vrot.slane %v340_v6, %v1708_v40  ;;  %v371_v44 = vcombine.low %v306_v36, %v322_v31  ;;  %v243_v45 = vrot.slane %v235_v35, %v1722_v54 }
 0x17b   :  { %v387_v1 = vcombine.low %v331_v56, %v347_v57  ;;  %v251_v4 = vcombine.low %v195_v60, %v211_v58  ;;  %v252_v5 = vcombine.high %v195_v60, %v211_v58  ;;  %v388_v7 = vcombine.high %v331_v56, %v347_v57 }
 0x17c   :  { %v267_v23 = vcombine.low %v202_v19, %v218_v10  ;;  %v403_v37 = vcombine.low %v338_v32, %v354_v25  ;;  %v268_v49 = vcombine.high %v202_v19, %v218_v10  ;;  %v379_v52 = vrot.slane %v371_v44, %v1722_v54 }
 0x17d   :  { %v395_v9 = vrot.slane %v387_v1, %v1722_v54  ;;  %v1741_v12 = vrot.slane %v251_v4, %v1722_v54  ;;  %v266_v13 = vrot.slane %v252_v5, %v1722_v54  ;;  %v402_v20 = vrot.slane %v388_v7, %v1722_v54 }
 0x17e   :  { %v275_v43 = vrot.slane %v267_v23, %v1722_v54  ;;  %v411_v48 = vrot.slane %v403_v37, %v1722_v54  ;;  %v236_v53 = vcombine.high %v170_v18, %v186_v21  ;;  %v282_v59 = vrot.slane %v268_v49, %v1722_v54 }
 0x17f   :  { %v419_v17 = vcombine.low %v363_v8, %v395_v9  ;;  %v284_v22 = vcombine.high %v1738_v11, %v1741_v12  ;;  %v420_v27 = vcombine.high %v363_v8, %v395_v9  ;;  %v285_v30 = vcombine.low %v234_v24, %v266_v13 }
 0x180   :  { %v421_v39 = vcombine.low %v370_v34, %v402_v20  ;;  %v286_v42 = vcombine.high %v234_v24, %v266_v13  ;;  %v422_v47 = vcombine.high %v370_v34, %v402_v20  ;;  %v287_v51 = vcombine.low %v243_v45, %v275_v43 }
 0x181   :  { %v452_v26 = vsel %vm427_vm2, %v419_v17, -inf  ;;  %v431_v28 = vsel %vm427_vm2, %v284_v22, -inf  ;;  %v455_v38 = vsel %vm427_vm2, %v420_v27, -inf  ;;  %v434_v41 = vsel %vm427_vm2, %v285_v30, -inf }
 0x182   :  { %453 = vmax.xlane.f32.xlu0 %v452_v26  ;;  %432 = vmax.xlane.f32.xlu1 %v431_v28  ;;  %v458_v46 = vsel %vm427_vm2, %v421_v39, -inf  ;;  %v437_v50 = vsel %vm427_vm2, %v286_v42, -inf  ;;  %v461_v55 = vsel %vm427_vm2, %v422_v47, -inf  ;;  %v423_v56 = vcombine.low %v379_v52, %v411_v48 }
 0x183   :  { %v440_v57 = vsel %vm427_vm2, %v287_v51, -inf  ;;  %v288_v58 = vcombine.high %v243_v45, %v275_v43  ;;  %v250_v60 = vrot.slane %v236_v53, %v1722_v54  ;;  %v404_v61 = vcombine.high %v338_v32, %v354_v25 }
 0x184   :  { %v464_v62 = vsel %vm427_vm2, %v423_v56, -inf  ;;  %v424_v63 = vcombine.high %v379_v52, %v411_v48  ;;  %v372_v2 = vcombine.high %v306_v36, %v322_v31  ;;  %v283_v4 = vcombine.low %v1738_v11, %v1741_v12  ;;  %v476_v12 = vld [vmem:[%s2127_s1 + $0x10] sm:$0xff] }
 0x185   :  { %v443_v0 = vsel %vm427_vm2, %v288_v58, -inf  ;;  %v289_v1 = vcombine.low %v250_v60, %v282_v59  ;;  %v418_v5 = vrot.slane %v404_v61, %v1722_v54  ;;  %v290_v7 = vcombine.high %v250_v60, %v282_v59  ;;  %1491 = vmatprep.mubr.msk.f32.mxu1 %vm23_vm0, %v476_v12 }
 0x186   :  { %456 = vmax.xlane.f32.xlu0 %v455_v38  ;;  %435 = vmax.xlane.f32.xlu1 %v434_v41  ;;  %v467_v3 = vsel %vm427_vm2, %v424_v63, -inf  ;;  %v386_v8 = vrot.slane %v372_v2, %v1722_v54  ;;  %v428_v9 = vsel %vm427_vm2, %v283_v4, -inf  ;;  %v583_v19 = vadd.s32 1, %v1791_v16 }
 0x187   :  { %v446_v6 = vsel %vm427_vm2, %v289_v1, -inf  ;;  %v449_v13 = vsel %vm427_vm2, %v290_v7, -inf  ;;  %v664_v22 = vadd.s32 2, %v1791_v16  ;;  %v745_v24 = vadd.s32 3, %v1791_v16 }
 0x188   :  { %v425_v10 = vcombine.low %v386_v8, %v418_v5  ;;  %v426_v15 = vcombine.high %v386_v8, %v418_v5  ;;  %v1802_v27 = vsub.s32 %v1791_v16, %v1702_v33  ;;  %v1805_v20 = vsub.s32 %v583_v19, %v1702_v33 }
 0x189   :  { %v1808_v29 = vsub.s32 %v664_v22, %v1702_v33  ;;  %v1811_v21 = vsub.s32 %v745_v24, %v1702_v33 }
 0x18a   :  { %459 = vmax.xlane.f32.xlu0 %v458_v46  ;;  %438 = vmax.xlane.f32.xlu1 %v437_v50  ;;  %v470_v14 = vsel %vm427_vm2, %v425_v10, -inf  ;;  %v473_v11 = vsel %vm427_vm2, %v426_v15, -inf }
 0x18e   :  { %462 = vmax.xlane.f32.xlu0 %v461_v55  ;;  %441 = vmax.xlane.f32.xlu1 %v440_v57 }
 0x192   :  { %465 = vmax.xlane.f32.xlu0 %v464_v62  ;;  %444 = vmax.xlane.f32.xlu1 %v443_v0 }
 0x196   :  { %468 = vmax.xlane.f32.xlu0 %v467_v3  ;;  %447 = vmax.xlane.f32.xlu1 %v446_v6 }
 0x19a   :  { %429 = vmax.xlane.f32.xlu0 %v428_v9  ;;  %450 = vmax.xlane.f32.xlu1 %v449_v13 }
 0x19e   :  { %471 = vmax.xlane.f32.xlu0 %v470_v14 }
 0x1a2   :  { %474 = vmax.xlane.f32.xlu0 %v473_v11 }
 0x20f   :  { %v454_v17 = vpop.xlane.xlu0 %453  ;;  %v1793_v18 = vpop.xlane.xlu1 %432 }
 0x210   :  { %v531_v30 = vrot.slane %v454_v17, %v1802_v27  ;;  %v619_v31 = vrot.slane %v454_v17, %v1805_v20  ;;  %v700_v32 = vrot.slane %v454_v17, %v1808_v29  ;;  %v781_v34 = vrot.slane %v454_v17, %v1811_v21 }
 0x211   :  { %v503_v37 = vrot.slane %v1793_v18, %v1802_v27  ;;  %v591_v43 = vrot.slane %v1793_v18, %v1805_v20  ;;  %v672_v44 = vrot.slane %v1793_v18, %v1808_v29  ;;  %v753_v45 = vrot.slane %v1793_v18, %v1811_v21 }
 0x213   :  { %v457_v25 = vpop.xlane.xlu0 %456  ;;  %v1798_v26 = vpop.xlane.xlu1 %435 }
 0x214   :  { %v535_v35 = vrot.slane %v457_v25, %v1802_v27  ;;  %v623_v38 = vrot.slane %v457_v25, %v1805_v20  ;;  %v704_v39 = vrot.slane %v457_v25, %v1808_v29  ;;  %v785_v41 = vrot.slane %v457_v25, %v1811_v21 }
 0x215   :  { %v507_v46 = vrot.slane %v1798_v26, %v1802_v27  ;;  %v595_v47 = vrot.slane %v1798_v26, %v1805_v20  ;;  %v676_v48 = vrot.slane %v1798_v26, %v1808_v29  ;;  %v757_v49 = vrot.slane %v1798_v26, %v1811_v21 }
 0x216   :  { %v574_v51 = vsel %vm560_vm3, %v535_v35, %v531_v30  ;;  %v655_v57 = vsel %vm560_vm3, %v623_v38, %v619_v31  ;;  %v736_v58 = vsel %vm560_vm3, %v704_v39, %v700_v32  ;;  %v817_v59 = vsel %vm560_vm3, %v785_v41, %v781_v34 }
 0x217   :  { %v460_v23 = vpop.xlane.xlu0 %459  ;;  %v1813_v28 = vpop.xlane.xlu1 %438 }
 0x218   :  { %v539_v50 = vrot.slane %v460_v23, %v1802_v27  ;;  %v627_v52 = vrot.slane %v460_v23, %v1805_v20  ;;  %v708_v53 = vrot.slane %v460_v23, %v1808_v29  ;;  %v789_v55 = vrot.slane %v460_v23, %v1811_v21 }
 0x219   :  { %v511_v62 = vrot.slane %v1813_v28, %v1802_v27  ;;  %v599_v63 = vrot.slane %v1813_v28, %v1805_v20  ;;  %v680_v2 = vrot.slane %v1813_v28, %v1808_v29  ;;  %v761_v3 = vrot.slane %v1813_v28, %v1811_v21 }
 0x21a   :  { %v575_v4 = vsel %vm562_vm4, %v539_v50, %v574_v51  ;;  %v656_v6 = vsel %vm562_vm4, %v627_v52, %v655_v57  ;;  %v737_v7 = vsel %vm562_vm4, %v708_v53, %v736_v58  ;;  %v818_v8 = vsel %vm562_vm4, %v789_v55, %v817_v59 }
 0x21b   :  { %v463_v36 = vpop.xlane.xlu0 %462  ;;  %v1825_v42 = vpop.xlane.xlu1 %441 }
 0x21c   :  { %v543_v60 = vrot.slane %v463_v36, %v1802_v27  ;;  %v631_v0 = vrot.slane %v463_v36, %v1805_v20  ;;  %v712_v1 = vrot.slane %v463_v36, %v1808_v29  ;;  %v793_v5 = vrot.slane %v463_v36, %v1811_v21 }
 0x21d   :  { %v515_v9 = vrot.slane %v1825_v42, %v1802_v27  ;;  %v603_v13 = vrot.slane %v1825_v42, %v1805_v20  ;;  %v684_v14 = vrot.slane %v1825_v42, %v1808_v29  ;;  %v765_v15 = vrot.slane %v1825_v42, %v1811_v21 }
 0x21e   :  { %v576_v11 = vsel %vm564_vm5, %v543_v60, %v575_v4  ;;  %v657_v12 = vsel %vm564_vm5, %v631_v0, %v656_v6  ;;  %v1882_v17 = vsel %vm564_vm5, %v712_v1, %v737_v7  ;;  %v1891_v25 = vsel %vm564_vm5, %v793_v5, %v818_v8 }
 0x21f   :  { %v1846_v56 = vpop.xlane.xlu0 %465  ;;  %v1852_v61 = vpop.xlane.xlu1 %444 }
 0x220   :  { %v547_v19 = vrot.slane %v1846_v56, %v1802_v27  ;;  %v635_v22 = vrot.slane %v1846_v56, %v1805_v20  ;;  %v519_v23 = vrot.slane %v1852_v61, %v1802_v27  ;;  %v716_v30 = vrot.slane %v1846_v56, %v1808_v29 }
 0x221   :  { %v797_v31 = vrot.slane %v1846_v56, %v1811_v21  ;;  %v607_v32 = vrot.slane %v1852_v61, %v1805_v20  ;;  %v688_v34 = vrot.slane %v1852_v61, %v1808_v29 }
 0x222   :  { %v658_v52 = vsel %vm566_vm6, %v635_v22, %v657_v12  ;;  %v577_v57 = vsel %vm566_vm6, %v547_v19, %v576_v11  ;;  %v739_v28 = vsel %vm566_vm6, %v716_v30, %v1882_v17 }
 0x223   :  { %v1871_v10 = vpop.xlane.xlu0 %468  ;;  %v1888_v24 = vpop.xlane.xlu1 %447 }
 0x224   :  { %v551_v35 = vrot.slane %v1871_v10, %v1802_v27  ;;  %v639_v36 = vrot.slane %v1871_v10, %v1805_v20  ;;  %v523_v53 = vrot.slane %v1888_v24, %v1802_v27  ;;  %v720_v55 = vrot.slane %v1871_v10, %v1808_v29 }
 0x225   :  { %v611_v1 = vrot.slane %v1888_v24, %v1805_v20 }
 0x226   :  { %v659_v6 = vsel %vm568_vm7, %v639_v36, %v658_v52 }
 0x227   :  { %v430_v38 = vpop.xlane.xlu0 %429  ;;  %v1935_v4 = vpop.xlane.xlu1 %450 }
 0x228   :  { %v499_v39 = vrot.slane %v430_v38, %v1802_v27  ;;  %v587_v41 = vrot.slane %v430_v38, %v1805_v20  ;;  %v668_v50 = vrot.slane %v430_v38, %v1808_v29  ;;  %v749_v51 = vrot.slane %v430_v38, %v1811_v21 }
 0x229   :  { %v527_v11 = vrot.slane %v1935_v4, %v1802_v27  ;;  %v615_v26 = vrot.slane %v1935_v4, %v1805_v20 }
 0x22a   :  { %v561_v58 = vsel %vm560_vm3, %v503_v37, %v499_v39  ;;  %v648_v59 = vsel %vm560_vm3, %v591_v43, %v587_v41  ;;  %v729_v60 = vsel %vm560_vm3, %v672_v44, %v668_v50  ;;  %v810_v0 = vsel %vm560_vm3, %v753_v45, %v749_v51 }
 0x22b   :  { %v563_v37 = vsel %vm562_vm4, %v507_v46, %v561_v58  ;;  %v649_v43 = vsel %vm562_vm4, %v595_v47, %v648_v59  ;;  %v730_v18 = vsel %vm562_vm4, %v676_v48, %v729_v60  ;;  %v472_v44 = vpop.xlane.xlu0 %471  ;;  %v811_v45 = vsel %vm562_vm4, %v757_v49, %v810_v0 }
 0x22c   :  { %v555_v5 = vrot.slane %v472_v44, %v1802_v27  ;;  %v578_v46 = vsel %vm568_vm7, %v551_v35, %v577_v57  ;;  %v643_v7 = vrot.slane %v472_v44, %v1805_v20  ;;  %v565_v47 = vsel %vm564_vm5, %v511_v62, %v563_v37 }
 0x22d   :  { %v650_v8 = vsel %vm564_vm5, %v599_v63, %v649_v43  ;;  %v731_v48 = vsel %vm564_vm5, %v680_v2, %v730_v18  ;;  %v567_v49 = vsel %vm566_vm6, %v515_v9, %v565_v47  ;;  %v724_v19 = vrot.slane %v472_v44, %v1808_v29 }
 0x22e   :  { %v651_v12 = vsel %vm566_vm6, %v603_v13, %v650_v8  ;;  %v569_v35 = vsel %vm568_vm7, %v519_v23, %v567_v49  ;;  %v732_v63 = vsel %vm566_vm6, %v684_v14, %v731_v48  ;;  %v579_v38 = vsel %vm570_vm8, %v555_v5, %v578_v46 }
 0x22f   :  { %v475_v22 = vpop.xlane.xlu0 %474  ;;  %v652_v62 = vsel %vm568_vm7, %v607_v32, %v651_v12  ;;  %v812_v9 = vsel %vm564_vm5, %v761_v3, %v811_v45  ;;  %v571_v39 = vsel %vm570_vm8, %v523_v53, %v569_v35  ;;  %v660_v32 = vsel %vm570_vm8, %v643_v7, %v659_v6  ;;  %v477_v45 = vld [vmem:[%s2127_s1 + $0x18] sm:$0xff] }
 0x230   :  { %v559_v2 = vrot.slane %v475_v22, %v1802_v27  ;;  %v647_v36 = vrot.slane %v475_v22, %v1805_v20  ;;  %v728_v13 = vrot.slane %v475_v22, %v1808_v29  ;;  %v653_v23 = vsel %vm570_vm8, %v611_v1, %v652_v62 }
 0x231   :  { %v573_v14 = vsel %vm572_vm9, %v527_v11, %v571_v39  ;;  %v733_v50 = vsel %vm568_vm7, %v688_v34, %v732_v63  ;;  %v692_v3 = vrot.slane %v1888_v24, %v1808_v29  ;;  %v813_v52 = vsel %vm566_vm6, %v765_v15, %v812_v9 }
 0x232   :  { %v580_v41 = vsel %vm572_vm9, %v559_v2, %v579_v38  ;;  %v661_v20 = vsel %vm572_vm9, %v647_v36, %v660_v32  ;;  %v769_v53 = vrot.slane %v1852_v61, %v1811_v21  ;;  %v801_v57 = vrot.slane %v1871_v10, %v1811_v21 }
 0x233   :  { %v1528_v51 = vpack.c.bf16 %v580_v41, %v573_v14  ;;  %v654_v34 = vsel %vm572_vm9, %v615_v26, %v653_v23  ;;  %v740_v58 = vsel %vm568_vm7, %v720_v55, %v739_v28  ;;  %v805_v17 = vrot.slane %v472_v44, %v1811_v21 }
 0x234   :  { %v1532_v30 = vpack.c.bf16 %v661_v20, %v654_v34  ;;  %v734_v59 = vsel %vm570_vm8, %v692_v3, %v733_v50  ;;  %v741_v42 = vsel %vm570_vm8, %v724_v19, %v740_v58  ;;  %v696_v15 = vrot.slane %v1935_v4, %v1808_v29 }
 0x235   :  { %1529 = vmatprep.subr.bf16.mxu1 %v1528_v51  ;;  %v809_v61 = vrot.slane %v475_v22, %v1811_v21  ;;  %v742_v10 = vsel %vm572_vm9, %v728_v13, %v741_v42  ;;  %v814_v60 = vsel %vm568_vm7, %v769_v53, %v813_v52  ;;  %v820_v55 = vsel %vm566_vm6, %v797_v31, %v1891_v25 }
 0x236   :  { %1531 = vmatpush3.bf16.msra.mxu1 %v1528_v51  ;;  %v773_v0 = vrot.slane %v1888_v24, %v1811_v21  ;;  %v735_v1 = vsel %vm572_vm9, %v696_v15, %v734_v59  ;;  %v821_v29 = vsel %vm568_vm7, %v801_v57, %v820_v55  ;;  %v777_v44 = vrot.slane %v1935_v4, %v1811_v21 }
 0x237   :  { %1533 = vmatprep.subr.bf16.mxu1 %v1532_v30  ;;  %v1536_v37 = vpack.c.bf16 %v742_v10, %v735_v1  ;;  %v822_v18 = vsel %vm570_vm8, %v805_v17, %v821_v29  ;;  %v1607_v31 = vmov 1.0   ;;  %v1608_v12 = vmov 0.0  }
 0x238   :  { %v815_v43 = vsel %vm570_vm8, %v773_v0, %v814_v60  ;;  %v823_v56 = vsel %vm572_vm9, %v809_v61, %v822_v18  ;;  %1498 = vmatprep.mubr.msk.f32.mxu0 %vm1611_vm11, %v1608_v12 }
 0x239   :  { %v816_v25 = vsel %vm572_vm9, %v777_v44, %v815_v43 }
 0x23a   :  { %1535 = vmatpush3.bf16.msra.mxu1 %v1532_v30  ;;  %v1540_v24 = vpack.c.bf16 %v823_v56, %v816_v25 }
 0x23b   :  { %1537 = vmatprep.subr.bf16.mxu1 %v1536_v37 }
 0x23e   :  { %1539 = vmatpush3.bf16.msra.mxu1 %v1536_v37 }
 0x23f   :  { %1541 = vmatprep.subr.bf16.mxu1 %v1540_v24 }
 0x242   :  { %1543 = vmatpush3.bf16.msra.mxu1 %v1540_v24 }
 0x243   :  { %1489 = vmatprep.subr.msk.mxu1 %vm30_vm1, %v1607_v31 }
 0x246   :  { %1490 = vmatpush3.msk.msra.mxu1 %vm30_vm1, %v1607_v31 }
 0x247   :  { %1492 = vmatmul.mubr.msk.f32.vlgmr.msra.gmra.mrb[0].mxu1 %vm23_vm0, %v477_v45  ;;  %vm1384_vm0 = vcmask 1041408  }
 0x248   :  { %1509 = vmatprep.mubr.msk.f32.mxu1 %vm1611_vm11, %v1608_v12 }
 0x31a   :  { %v1493_v21 = vpop.f32.mrb[0].mxu1 }
 0x31b   :  { %v911_v4 = vmax.f32 %v1493_v21, 0.0  ;;  %v901_v5 = vpop.f32.mrb[1].mxu1  ;;  %v1609_v21 = vmov 0  }
 0x31c   :  { %v910_v46 = vmax.f32 %v901_v5, 0.0  ;;  %1568 = vset.pattern.permute.xlu1 %v1609_v21  ;;  %1569 = vset.pattern.permute.xlu0 %v1609_v21 }
 0x31d   :  { %916 = vrot.lane.b32.xlu0 %v911_v4, %s1599_s0  ;;  %v993_v7 = vrot.slane %v911_v4, %v1708_v40  ;;  %v986_v63 = vcombine.high %v911_v4, %v1608_v12 }
 0x31e   :  { %914 = vrot.lane.b32.xlu1 %v910_v46, %s1599_s0  ;;  %v927_v11 = vrot.slane %v910_v46, %v1708_v40  ;;  %v920_v14 = vcombine.high %v910_v46, %v1608_v12 }
 0x31f   :  { %v1000_v20 = vrot.slane %v986_v63, %v1708_v40 }
 0x320   :  { %v934_v57 = vrot.slane %v920_v14, %v1708_v40 }
 0x38f   :  { %v917_v6 = vpop.permute.xlu0 %916 }
 0x390   :  { %v1008_v47 = vrot.slane %v917_v6, %v1708_v40  ;;  %v915_v8 = vpop.permute.xlu1 %914  ;;  %v1001_v19 = vcombine.high %v917_v6, %v1608_v12 }
 0x391   :  { %v942_v48 = vrot.slane %v915_v8, %v1708_v40  ;;  %v935_v9 = vcombine.high %v915_v8, %v1608_v12 }
 0x392   :  { %v1016_v26 = vcombine.low %v993_v7, %v1008_v47  ;;  %v1017_v49 = vcombine.high %v993_v7, %v1008_v47  ;;  %v1015_v38 = vrot.slane %v1001_v19, %v1708_v40 }
 0x393   :  { %v950_v22 = vcombine.low %v927_v11, %v942_v48  ;;  %v951_v13 = vcombine.high %v927_v11, %v942_v48  ;;  %v949_v50 = vrot.slane %v935_v9, %v1708_v40 }
 0x394   :  { %v1024_v35 = vrot.slane %v1016_v26, %v1722_v54  ;;  %v1031_v62 = vrot.slane %v1017_v49, %v1722_v54  ;;  %v1032_v52 = vcombine.low %v1000_v20, %v1015_v38  ;;  %v1033_v29 = vcombine.high %v1000_v20, %v1015_v38 }
 0x395   :  { %v958_v32 = vrot.slane %v950_v22, %v1722_v54  ;;  %v965_v51 = vrot.slane %v951_v13, %v1722_v54  ;;  %v966_v30 = vcombine.low %v934_v57, %v949_v50  ;;  %v967_v10 = vcombine.high %v934_v57, %v949_v50 }
 0x396   :  { %v1077_v2 = vsel %vm1052_vm10, %v1024_v35, -inf  ;;  %v1048_v36 = vcombine.high %v1024_v35, %v1608_v12  ;;  %v1049_v23 = vcombine.high %v1031_v62, %v1608_v12  ;;  %v1083_v41 = vsel %vm1052_vm10, %v1031_v62, -inf }
 0x397   :  { %1078 = vmax.xlane.f32.xlu1 %v1077_v2  ;;  %v982_v3 = vcombine.high %v958_v32, %v1608_v12  ;;  %v1053_v53 = vsel %vm1052_vm10, %v958_v32, -inf  ;;  %v983_v58 = vcombine.high %v965_v51, %v1608_v12  ;;  %v1040_v17 = vrot.slane %v1032_v52, %v1722_v54 }
 0x398   :  { %v1080_v39 = vsel %vm1052_vm10, %v1048_v36, -inf  ;;  %v1086_v28 = vsel %vm1052_vm10, %v1049_v23, -inf  ;;  %v1059_v59 = vsel %vm1052_vm10, %v965_v51, -inf  ;;  %v974_v61 = vrot.slane %v966_v30, %v1722_v54  ;;  %v1102_v30 = vld [vmem:[%s2127_s1 + $0x28] sm:$0xff] }
 0x399   :  { %1081 = vmax.xlane.f32.xlu0 %v1080_v39  ;;  %v1056_v34 = vsel %vm1052_vm10, %v982_v3, -inf  ;;  %v1062_v42 = vsel %vm1052_vm10, %v983_v58, -inf  ;;  %v1050_v15 = vcombine.high %v1040_v17, %v1608_v12  ;;  %v1089_v60 = vsel %vm1052_vm10, %v1040_v17, -inf  ;;  %v1101_v17 = vld [vmem:[%s2127_s1 + $0x20] sm:$0xff] }
 0x39a   :  { %v984_v0 = vcombine.high %v974_v61, %v1608_v12  ;;  %v981_v1 = vrot.slane %v967_v10, %v1722_v54  ;;  %v1065_v37 = vsel %vm1052_vm10, %v974_v61, -inf  ;;  %v1047_v44 = vrot.slane %v1033_v29, %v1722_v54 }
 0x39b   :  { %1084 = vmax.xlane.f32.xlu1 %v1083_v41  ;;  %v1092_v55 = vsel %vm1052_vm10, %v1050_v15, -inf  ;;  %v1610_v58 = vmov 0.0|0.0   ;;  %v1208_v10 = vadd.s32 4294967288, %v1791_v16 }
 0x39c   :  { %v1068_v43 = vsel %vm1052_vm10, %v984_v0, -inf  ;;  %v985_v18 = vcombine.high %v981_v1, %v1608_v12  ;;  %v1071_v56 = vsel %vm1052_vm10, %v981_v1, -inf  ;;  %v1051_v24 = vcombine.high %v1047_v44, %v1608_v12  ;;  %1544 = vmatprep.subr.bf16.mxu0 %v1610_v58  ;;  %1547 = vmatprep.subr.bf16.mxu1 %v1610_v58 }
 0x39d   :  { %1087 = vmax.xlane.f32.xlu0 %v1086_v28  ;;  %v1095_v31 = vsel %vm1052_vm10, %v1047_v44, -inf }
 0x39e   :  { %v1074_v25 = vsel %vm1052_vm10, %v985_v18, -inf  ;;  %v1098_v45 = vsel %vm1052_vm10, %v1051_v24, -inf }
 0x39f   :  { %1054 = vmax.xlane.f32.xlu1 %v1053_v53 }
 0x3a1   :  { %1057 = vmax.xlane.f32.xlu0 %v1056_v34 }
 0x3a3   :  { %1060 = vmax.xlane.f32.xlu1 %v1059_v59  ;;  %v1545_v59 = vpack.c.bf16 %v1102_v30, %v1101_v17 }
 0x3a5   :  { %1063 = vmax.xlane.f32.xlu0 %v1062_v42  ;;  %v1300_v42 = vld [vmem:[%s2127_s1 + $0x40] sm:$0xff]  ;;  %1546 = vmatpush3.bf16.msra.mxu0 %v1545_v59 }
 0x3a7   :  { %1090 = vmax.xlane.f32.xlu1 %v1089_v60  ;;  %v1211_v60 = vsub.s32 %v1208_v10, %v1702_v33  ;;  %v1301_v33 = vld [vmem:[%s2127_s1 + $0x48] sm:$0xff] }
 0x3a9   :  { %1093 = vmax.xlane.f32.xlu0 %v1092_v55 }
 0x3ab   :  { %1066 = vmax.xlane.f32.xlu1 %v1065_v37 }
 0x3ad   :  { %1069 = vmax.xlane.f32.xlu0 %v1068_v43 }
 0x3af   :  { %1072 = vmax.xlane.f32.xlu1 %v1071_v56 }
 0x3b1   :  { %1075 = vmax.xlane.f32.xlu0 %v1074_v25  ;;  %v1302_v25 = vld [vmem:[%s2127_s1 + $0x50] sm:$0xff] }
 0x3b2   :  { %v1551_v24 = vpack.c.bf16 %v1302_v25, %v1301_v33 }
 0x3b3   :  { %1096 = vmax.xlane.f32.xlu1 %v1095_v31 }
 0x3b5   :  { %1099 = vmax.xlane.f32.xlu0 %v1098_v45 }
 0x424   :  { %v1079_v4 = vpop.xlane.xlu1 %1078 }
 0x426   :  { %v1082_v54 = vpop.xlane.xlu0 %1081 }
 0x427   :  { %v1158_v19 = vcombine.low %v1079_v4, %v1082_v54  ;;  %v1420_v54 = vld [vmem:[%s2127_s1 + $0x58] ss:$0 sm:$0xff] }
 0x428   :  { %v1085_v5 = vpop.xlane.xlu1 %1084 }
 0x429   :  { %v1166_v38 = vrot.slane %v1158_v19, %v1708_v40 }
 0x42a   :  { %v1088_v46 = vpop.xlane.xlu0 %1087 }
 0x42b   :  { %v1159_v11 = vcombine.low %v1085_v5, %v1088_v46 }
 0x42c   :  { %v1055_v6 = vpop.xlane.xlu1 %1054 }
 0x42d   :  { %v1173_v63 = vrot.slane %v1159_v11, %v1708_v40 }
 0x42e   :  { %v1058_v7 = vpop.xlane.xlu0 %1057 }
 0x42f   :  { %v1124_v8 = vcombine.low %v1055_v6, %v1058_v7  ;;  %v1174_v13 = vcombine.low %v1166_v38, %v1173_v63 }
 0x430   :  { %v1061_v47 = vpop.xlane.xlu1 %1060 }
 0x431   :  { %v1132_v22 = vrot.slane %v1124_v8, %v1708_v40 }
 0x432   :  { %v1064_v48 = vpop.xlane.xlu0 %1063 }
 0x433   :  { %v1125_v26 = vcombine.low %v1061_v47, %v1064_v48 }
 0x434   :  { %v1091_v49 = vpop.xlane.xlu1 %1090 }
 0x435   :  { %v1139_v35 = vrot.slane %v1125_v26, %v1708_v40 }
 0x436   :  { %v1094_v62 = vpop.xlane.xlu0 %1093 }
 0x437   :  { %v1140_v2 = vcombine.low %v1132_v22, %v1139_v35  ;;  %v1175_v41 = vcombine.low %v1091_v49, %v1094_v62 }
 0x438   :  { %v1067_v36 = vpop.xlane.xlu1 %1066 }
 0x439   :  { %1193 = vperm.xlu1 %1568, %v1140_v2   ;;  %v1183_v53 = vrot.slane %v1175_v41, %v1708_v40 }
 0x43a   :  { %v1070_v9 = vpop.xlane.xlu0 %1069 }
 0x43b   :  { %v1141_v23 = vcombine.low %v1067_v36, %v1070_v9 }
 0x43c   :  { %v1073_v39 = vpop.xlane.xlu1 %1072 }
 0x43d   :  { %1199 = vperm.xlu1 %1568, %v1174_v13   ;;  %v1149_v20 = vrot.slane %v1141_v23, %v1708_v40 }
 0x43e   :  { %v1076_v32 = vpop.xlane.xlu0 %1075 }
 0x43f   :  { %v1142_v14 = vcombine.low %v1073_v39, %v1076_v32 }
 0x440   :  { %v1097_v28 = vpop.xlane.xlu1 %1096 }
 0x441   :  { %v1156_v50 = vrot.slane %v1142_v14, %v1708_v40 }
 0x442   :  { %v1100_v3 = vpop.xlane.xlu0 %1099 }
 0x443   :  { %v1176_v51 = vcombine.low %v1097_v28, %v1100_v3  ;;  %v1157_v52 = vcombine.low %v1149_v20, %v1156_v50 }
 0x445   :  { %v1190_v57 = vrot.slane %v1176_v51, %v1708_v40  ;;  %1196 = vperm.xlu0 %1569, %v1157_v52   ;;  %v1299_v40 = vld [vmem:[%s2127_s1 + $0x38] sm:$0xff] }
 0x446   :  { %v1548_v15 = vpack.c.bf16 %v1300_v42, %v1299_v40 }
 0x447   :  { %v1191_v34 = vcombine.low %v1183_v53, %v1190_v57 }
 0x448   :  { %1549 = vmatpush3.bf16.msra.mxu1 %v1548_v15 }
 0x449   :  { %1202 = vperm.xlu1 %1568, %v1191_v34   ;;  %1550 = vmatprep.subr.bf16.mxu1 %v1610_v58 }
 0x44c   :  { %1552 = vmatpush3.bf16.msra.mxu1 %v1551_v24 }
 0x4b8   :  { %v1194_v61 = vpop.permute.xlu1 %1193 }
 0x4b9   :  { %v1207_v29 = vrot.slane %v1194_v61, %v1802_v27 }
 0x4bc   :  { %v1200_v55 = vpop.permute.xlu1 %1199 }
 0x4bd   :  { %v1218_v37 = vrot.slane %v1200_v55, %v1802_v27  ;;  %v1418_v27 = vld [vmem:[%s2127_s1 + $0x30] ss:$0 sm:$0xff]  ;;  %s1612_s1 = smov [#allocation2]  }
 0x4be   :  { %s1404_s29 = sshll.u32 %s1612_s1, 4  ;;  %s1405_s29 = int_to_ptr.vmem [resolvable:$true] %s1404_s29 }
 0x4bf   :  { %s1574_s30 = scalar_lea.vmem %s1405_s29, 32  ;;  %p1579_p1 = scmp.lt.s32.totalorder %s1405_s29, %s1405_s29 }
 0x4c0   :  { %p1575_p0 = scmp.ne.s32.totalorder %s1405_s29, %s1574_s30  ;;  %p1580_p2 = scmp.lt.s32.totalorder %s1574_s30, %s1574_s30 }
 0x4c2   :  { %p1581_p3 = por %p1580_p2, %p1579_p1 }
 0x4c4   :  { %v1197_v0 = vpop.permute.xlu0 %1196  ;;  %p1582_p4 = pnand %p1581_p3, %p1575_p0 }
 0x4c5   :  { %v1212_v12 = vrot.slane %v1197_v0, %v1211_v60 }
 0x4c7   :  { %v1214_v18 = vsel %vm1213_vm12, %v1212_v12, %v1207_v29 }
 0x4c8   :  { %v1203_v1 = vpop.permute.xlu1 %1202 }
 0x4c9   :  { %v1222_v43 = vrot.slane %v1203_v1, %v1211_v60 }
 0x4cb   :  { %v1223_v44 = vsel %vm1213_vm12, %v1222_v43, %v1218_v37 }
 0x4cc   :  { %v1224_v56 = vsel %vm560_vm3, %v1223_v44, %v1214_v18 }
 0x4cd   :  { %1499 = vmatmul.mubr.msk.f32.vlgmr.msra.gmra.mrb[2].mxu0 %vm1225_vm13, %v1224_v56 }
 0x5a0   :  { %v1294_v31 = vpop.f32.mrb[2].mxu0 }
 0x5a1   :  { %v1295_v45 = vadd.f32 %v1418_v27, %v1294_v31  ;;  %v1500_v21 = vpop.f32.mrb[3].mxu0 }
 0x5a3   :  { %v1298_v4 = vmax.f32 %v1295_v45, 0.0 }
 0x5a5   :  { %1510 = vmatmul.mubr.msk.f32.vlgmr.msra.gmra.mrb[2].mxu1 %vm1308_vm14, %v1298_v4 }
 0x678   :  { %v1378_v5 = vpop.f32.mrb[2].mxu1 }
 0x679   :  { %v1379_v46 = vadd.f32 %v1420_v54, %v1378_v5  ;;  %v1511_v6 = vpop.f32.mrb[3].mxu1 }
 0x67b   :  { %v1383_v7 = vsel %vm1382_vm15, %v1379_v46, -inf }
 0x67c   :  { %v1385_v47 = vsel %vm1384_vm0, %v1383_v7, -inf }
 0x67d   :  { %1386 = vmax.xlane.f32.xlu1 %v1385_v47 }
 0x70a   :  { %v1387_v8 = vpop.xlane.xlu1 %1386 }
 0x70b   :  { %v1388_v48 = vsub.f32 %v1379_v46, %v1387_v8 }
 0x70d   :  { %v1389_v11 = vmul.f32 1.442695, %v1388_v48 }
 0x70f   :  { %1570 = vpow2.f32 %v1389_v11 }
 0x719   :  { %v1571_v26 = vpop.eup %1570 }
 0x71a   :  { %v1391_v49 = vsel %vm1382_vm15, %v1571_v26, 0.0 }
 0x71b   :  { %v1392_v19 = vsel %vm1384_vm0, %v1391_v49, 0.0 }
 0x71c   :  { %1393 = vadd.xlane.f32.xlu0 %v1392_v19 }
 0x7a9   :  { %v1394_v22 = vpop.xlane.xlu0 %1393 }
 0x7aa   :  { %1572 = vrcp.f32 %v1394_v22 }
 0x7b4   :  { %v1573_v35 = vpop.eup %1572 }
 0x7b5   :  { %v1396_v16 = vmul.f32 %v1573_v35, %v1391_v49 }
 0x7b7   :  { %1397 = vst [vmem:[#allocation2] sm:$0x3] %v1396_v16 }
 0x7b8   :  { %1585 = shalt.err (!%p1582_p4)
}
 0x7b9   :  { %s1586_s4 = scalar_lea.hbm %s2128_s2, 32 }
 0x7ba   :  { %p1587_p5 = scmp.ne.s32.totalorder %s2128_s2, %s1586_s4  ;;  %p1590_p6 = scmp.lt.u32.totalorder %s1586_s4, %s2128_s2 }
 0x7bc   :  { %p1592_p7 = pnand %p1590_p6, %p1587_p5 }
 0x7be   :  { %1595 = shalt.err (!%p1592_p7)
}
 0x7bf   :  { %1407 = dma.vmem_to_hbm [thread:$0]  %s1405_s29, 32, %s2128_s2, [#allocation3]  }
 0x7c0   :  { %1596 = dma.done.wait [#allocation3], 32  }
 0x7c1   :  { %1597 = vsyncadd [#allocation3], 4294967264 }
 0x7c2   :  { %1411 = vsyncpa [#allocation3], 1 }

</bundles_post_ra>
